<compile_context>
chip_gen: v6e
topology: v6e:2x2x1
jax: 0.10.0
libtpu: 0.0.40
codegen_flags: <defaults>
</compile_context>

<pallas_src>
import functools

import jax
import jax.numpy as jnp
from jax.experimental import pallas as pl
from jax.experimental.pallas import tpu as pltpu


def gcn_two_kernel(x_ref, adj_ref, w1_ref, w2_ref, o_ref, *,
                   shared_weights, matmul_dtype):
    """One grid step processes a block of `block_b` graphs.

    x_ref:   (Bt, N, F)
    adj_ref: (Bt, N, N)
    w1_ref:  (Bt, F, H)  or (F, H) when shared_weights
    w2_ref:  (Bt, H, O)  or (H, O) when shared_weights
    o_ref:   (Bt, N, O)
    """
    x = x_ref[...]
    adj = adj_ref[...]
    w1 = w1_ref[...]
    w2 = w2_ref[...]

    bt, n, f = x.shape
    h = w1.shape[-1]
    o = w2.shape[-1]

    def cast(v):
        # MXU-operand dtype (e.g. bf16); accumulation stays f32 via
        # preferred_element_type.  Identity when matmul_dtype is None.
        return v if matmul_dtype is None else v.astype(matmul_dtype)

    adj_m = cast(adj)

    # ---- Layer 1: h1 = relu(A @ (X @ W1)) ----------------------------------
    if shared_weights:
        # Fold the batch into the matmul M dimension: (Bt*N, F) @ (F, H).
        s1 = jnp.dot(cast(x).reshape(bt * n, f), cast(w1),
                     preferred_element_type=jnp.float32).reshape(bt, n, h)
    else:
        s1 = jnp.einsum("bnf,bfh->bnh", cast(x), cast(w1),
                        preferred_element_type=jnp.float32)
    h1 = jnp.maximum(
        jnp.einsum("bnm,bmh->bnh", adj_m, cast(s1),
                   preferred_element_type=jnp.float32),
        0.0)

    # Dropout (eval mode) -> identity.
    # TODO(synk): training-mode dropout (p=0.2) would use pltpu.prng_seed /
    # pltpu.prng_random_bits here.

    # ---- Layer 2: out = relu(A @ (H1 @ W2)) + h1 ---------------------------
    if shared_weights:
        s2 = jnp.dot(cast(h1).reshape(bt * n, h), cast(w2),
                     preferred_element_type=jnp.float32).reshape(bt, n, o)
    else:
        s2 = jnp.einsum("bnh,bho->bno", cast(h1), cast(w2),
                        preferred_element_type=jnp.float32)
    h2 = jnp.maximum(
        jnp.einsum("bnm,bmo->bno", adj_m, cast(s2),
                   preferred_element_type=jnp.float32),
        0.0)

    # Residual add + final cast in f32 on the VPU.
    o_ref[...] = (h2 + h1).astype(o_ref.dtype)


def gcn_two(x, adj, w1, w2, *, block_b=None, matmul_dtype=None,
            vmem_limit_bytes=None):
    """x: (B,N,F), adj: (B,N,N), w1: (B,F,H) or (F,H), w2: (B,H,O) or (H,O)."""
    B, N, F = x.shape
    shared = (w1.ndim == 2)
    H = w1.shape[-1]
    O = w2.shape[-1]
    assert adj.shape == (B, N, N)
    if shared:
        assert w1.shape == (F, H) and w2.shape == (H, O)
    else:
        assert w1.shape == (B, F, H) and w2.shape == (B, H, O)

    out_dtype = x.dtype
    if matmul_dtype is not None:
        # Ship operands to the kernel already in the MXU dtype: halves the
        # dominant HBM + double-buffered VMEM traffic (accumulation stays f32).
        x = x.astype(matmul_dtype)
        adj = adj.astype(matmul_dtype)
        w1 = w1.astype(matmul_dtype)
        w2 = w2.astype(matmul_dtype)

    in_itemsize = jnp.dtype(x.dtype).itemsize
    out_itemsize = jnp.dtype(out_dtype).itemsize

    # --- per-generation VMEM budget ------------------------------------------
    if vmem_limit_bytes is None:
        try:
            phys = getattr(pltpu.get_tpu_info(), "vmem_capacity_bytes",
                           128 * 2**20)
        except Exception:  # CPU / interpret / old runtime
            phys = 128 * 2**20
        # v5e/v6e (128 MiB physical) -> 64 MiB; v7x (64 MiB physical) -> 32 MiB.
        vmem_limit_bytes = min(phys // 2, 64 * 2**20)

    def vmem_estimate(bb):
        w_mult = 1 if shared else bb
        io = (bb * (N * F + N * N) * in_itemsize
              + w_mult * (F * H + H * O) * in_itemsize
              + bb * N * O * out_itemsize)
        # f32 intermediates s1/h1/s2/h2 plus roughly one extra buffer of cast
        # copies, plus compiler-internal scratch headroom.
        temps = 5 * bb * N * max(F, H, O) * 4
        headroom = 2 * 2**20
        return 2 * io + temps + headroom     # double-buffered IO blocks

    if block_b is None:
        # Keep >= min(B, 4) grid steps so each of v7x's two TensorCores gets at
        # least two steps (step i+1 prefetch hides the weight DMA), then pick
        # the largest block_b that fits the per-chip VMEM budget.
        min_grid = min(B, 4)
        candidates = [bb for bb in range(1, B + 1)
                      if B % bb == 0 and B // bb >= min_grid]
        fitting = [bb for bb in candidates
                   if vmem_estimate(bb) <= vmem_limit_bytes]
        block_b = max(fitting) if fitting else 1
    assert B % block_b == 0, "B must be divisible by block_b"
    grid_b = B // block_b

    est = vmem_estimate(block_b)
    if est > vmem_limit_bytes:
        raise ValueError(
            f"VMEM estimate {est / 2**20:.1f} MiB exceeds budget "
            f"{vmem_limit_bytes / 2**20:.1f} MiB; reduce block_b "
            f"(currently {block_b}) or raise vmem_limit_bytes "
            f"(v7x has only 64 MiB physical VMEM).")

    # Advisory cost estimate (on-wire dtypes; shared weights counted once).
    flops = 2 * B * N * (F * H + N * H + H * O + N * O)
    w_mult = 1 if shared else B
    bytes_accessed = (in_itemsize * (B * (N * F + N * N)
                                     + w_mult * (F * H + H * O))
                      + out_itemsize * B * N * O)

    if shared:
        w1_spec = pl.BlockSpec((F, H), lambda b: (0, 0))
        w2_spec = pl.BlockSpec((H, O), lambda b: (0, 0))
    else:
        w1_spec = pl.BlockSpec((block_b, F, H), lambda b: (b, 0, 0))
        w2_spec = pl.BlockSpec((block_b, H, O), lambda b: (b, 0, 0))

    kernel = functools.partial(gcn_two_kernel, shared_weights=shared,
                               matmul_dtype=matmul_dtype)

    return pl.pallas_call(
        kernel,
        out_shape=jax.ShapeDtypeStruct((B, N, O), out_dtype),
        grid_spec=pltpu.PrefetchScalarGridSpec(
            num_scalar_prefetch=0,
            grid=(grid_b,),
            in_specs=[
                pl.BlockSpec((block_b, N, F), lambda b: (b, 0, 0)),
                pl.BlockSpec((block_b, N, N), lambda b: (b, 0, 0)),
                w1_spec,
                w2_spec,
            ],
            out_specs=pl.BlockSpec((block_b, N, O), lambda b: (b, 0, 0)),
        ),
        compiler_params=pltpu.CompilerParams(
            dimension_semantics=("parallel",),
            vmem_limit_bytes=int(vmem_limit_bytes),
        ),
        cost_estimate=pl.CostEstimate(
            flops=flops, transcendentals=0, bytes_accessed=bytes_accessed),
    )(x, adj, w1, w2)


def reference(x, adj, w1, w2):
    # Pure-JAX reference mirroring the PyTorch forward (eval mode).
    if w1.ndim == 2:
        w1 = jnp.broadcast_to(w1, (x.shape[0],) + w1.shape)
        w2 = jnp.broadcast_to(w2, (x.shape[0],) + w2.shape)
    h1 = jax.nn.relu(jnp.einsum("bnm,bmh->bnh", adj,
                                jnp.einsum("bnf,bfh->bnh", x, w1)))
    h2 = jax.nn.relu(jnp.einsum("bnm,bmo->bno", adj,
                                jnp.einsum("bnh,bho->bno", h1, w2)))
    return h2 + h1


if __name__ == "__main__":
    # Small shapes consistent with the module. The real module uses
    # nfeat = nhid = nout = 768 (a multiple of 128); we scale down to 128 so
    # the demo stays small while keeping lane-dense (multiple-of-128) dims.
    B, N = 2, 16
    F = H = O = 128

    key = jax.random.PRNGKey(0)
    kx, kadj, kw1, kw2 = jax.random.split(key, 4)

    x = jax.random.normal(kx, (B, N, F), dtype=jnp.float32)
    adj = jax.random.uniform(kadj, (B, N, N), dtype=jnp.float32)

    # reset_parameters: U(-stdv, stdv) with stdv = 1/sqrt(in_features).
    stdv1 = 1.0 / float(F) ** 0.5
    stdv2 = 1.0 / float(H) ** 0.5
    w1 = jax.random.uniform(kw1, (B, F, H), dtype=jnp.float32,
                            minval=-stdv1, maxval=stdv1)
    w2 = jax.random.uniform(kw2, (B, H, O), dtype=jnp.float32,
                            minval=-stdv2, maxval=stdv2)

    # Per-batch weights (exactly matches the PyTorch module).
    out = jax.block_until_ready(gcn_two(x, adj, w1, w2))
    ref = jax.block_until_ready(reference(x, adj, w1, w2))
    assert out.shape == (B, N, O)
    assert jnp.allclose(out, ref, atol=1e-3, rtol=1e-3), (
        "per-batch mismatch vs reference: max abs diff "
        f"{float(jnp.max(jnp.abs(out - ref)))}")

    # Shared-weight fast path (weights DMA'd once, batch folded into M dim).
    w1s, w2s = w1[0], w2[0]
    out_s = jax.block_until_ready(gcn_two(x, adj, w1s, w2s))
    ref_s = jax.block_until_ready(reference(x, adj, w1s, w2s))
    assert jnp.allclose(out_s, ref_s, atol=1e-3, rtol=1e-3), (
        "shared-weight mismatch vs reference: max abs diff "
        f"{float(jnp.max(jnp.abs(out_s - ref_s)))}")

    print("KERNEL_OK")
</pallas_src>

<mosaic_0001>
module attributes {stable_mosaic.version = 11 : i64} {
  func.func @gcn_two_kernel(%arg0: i32, %arg1: memref<1x16x128xf32, #tpu.memory_space<vmem>>, %arg2: memref<1x16x16xf32, #tpu.memory_space<vmem>>, %arg3: memref<1x128x128xf32, #tpu.memory_space<vmem>>, %arg4: memref<1x128x128xf32, #tpu.memory_space<vmem>>, %arg5: memref<1x16x128xf32, #tpu.memory_space<vmem>>) attributes {dimension_semantics = [#tpu.dimension_semantics<parallel>], iteration_bounds = array<i64: 2>, scalar_prefetch = 0 : i64, scratch_operands = 0 : i64, tpu.core_type = #tpu.core_type<tc>, window_params = [{transform_indices = @transform_0, window_bounds = array<i64: 1, 16, 128>}, {transform_indices = @transform_1, window_bounds = array<i64: 1, 16, 16>}, {transform_indices = @transform_2, window_bounds = array<i64: 1, 128, 128>}, {transform_indices = @transform_3, window_bounds = array<i64: 1, 128, 128>}, {transform_indices = @transform_4, window_bounds = array<i64: 1, 16, 128>}]} {
    %c0 = arith.constant 0 : index
    %c0_0 = arith.constant 0 : index
    %c0_1 = arith.constant 0 : index
    %0 = vector.load %arg1[%c0, %c0_0, %c0_1] : memref<1x16x128xf32, #tpu.memory_space<vmem>>, vector<1x16x128xf32>
    %c0_2 = arith.constant 0 : index
    %c0_3 = arith.constant 0 : index
    %c0_4 = arith.constant 0 : index
    %1 = vector.load %arg2[%c0_2, %c0_3, %c0_4] : memref<1x16x16xf32, #tpu.memory_space<vmem>>, vector<1x16x16xf32>
    %c0_5 = arith.constant 0 : index
    %c0_6 = arith.constant 0 : index
    %c0_7 = arith.constant 0 : index
    %2 = vector.load %arg3[%c0_5, %c0_6, %c0_7] : memref<1x128x128xf32, #tpu.memory_space<vmem>>, vector<1x128x128xf32>
    %c0_8 = arith.constant 0 : index
    %c0_9 = arith.constant 0 : index
    %c0_10 = arith.constant 0 : index
    %3 = vector.load %arg4[%c0_8, %c0_9, %c0_10] : memref<1x128x128xf32, #tpu.memory_space<vmem>>, vector<1x128x128xf32>
    "tpu.trace_start"() <{level = 10 : i32, message = "bnf,bfh->bnh"}> : () -> ()
    %cst = arith.constant dense<0.000000e+00> : vector<1x16x128xf32>
    %4 = tpu.matmul %0, %2, %cst {dimension_numbers = #tpu.dot_dimension_numbers<[2], [1], [1], [2], [0, 0, 0, 1, 1, 2], [0], [0]>} : vector<1x16x128xf32>, vector<1x128x128xf32>, vector<1x16x128xf32> -> vector<1x16x128xf32>
    "tpu.trace_stop"() : () -> ()
    "tpu.trace_start"() <{level = 10 : i32, message = "bnm,bmh->bnh"}> : () -> ()
    %cst_11 = arith.constant dense<0.000000e+00> : vector<1x16x128xf32>
    %5 = tpu.matmul %1, %4, %cst_11 {dimension_numbers = #tpu.dot_dimension_numbers<[2], [1], [1], [2], [0, 0, 0, 1, 1, 2], [0], [0]>} : vector<1x16x16xf32>, vector<1x16x128xf32>, vector<1x16x128xf32> -> vector<1x16x128xf32>
    "tpu.trace_stop"() : () -> ()
    %cst_12 = arith.constant 0.000000e+00 : f32
    %6 = vector.broadcast %cst_12 : f32 to vector<1x16x128xf32>
    %7 = arith.maximumf %5, %6 : vector<1x16x128xf32>
    "tpu.trace_start"() <{level = 10 : i32, message = "bnh,bho->bno"}> : () -> ()
    %cst_13 = arith.constant dense<0.000000e+00> : vector<1x16x128xf32>
    %8 = tpu.matmul %7, %3, %cst_13 {dimension_numbers = #tpu.dot_dimension_numbers<[2], [1], [1], [2], [0, 0, 0, 1, 1, 2], [0], [0]>} : vector<1x16x128xf32>, vector<1x128x128xf32>, vector<1x16x128xf32> -> vector<1x16x128xf32>
    "tpu.trace_stop"() : () -> ()
    "tpu.trace_start"() <{level = 10 : i32, message = "bnm,bmo->bno"}> : () -> ()
    %cst_14 = arith.constant dense<0.000000e+00> : vector<1x16x128xf32>
    %9 = tpu.matmul %1, %8, %cst_14 {dimension_numbers = #tpu.dot_dimension_numbers<[2], [1], [1], [2], [0, 0, 0, 1, 1, 2], [0], [0]>} : vector<1x16x16xf32>, vector<1x16x128xf32>, vector<1x16x128xf32> -> vector<1x16x128xf32>
    "tpu.trace_stop"() : () -> ()
    %cst_15 = arith.constant 0.000000e+00 : f32
    %10 = vector.broadcast %cst_15 : f32 to vector<1x16x128xf32>
    %11 = arith.maximumf %9, %10 : vector<1x16x128xf32>
    %12 = arith.addf %11, %7 : vector<1x16x128xf32>
    %c0_16 = arith.constant 0 : index
    %c0_17 = arith.constant 0 : index
    %c0_18 = arith.constant 0 : index
    %13 = vector.load %arg5[%c0_16, %c0_17, %c0_18] : memref<1x16x128xf32, #tpu.memory_space<vmem>>, vector<1x16x128xf32>
    tpu.vector_store %arg5[%c0_16, %c0_17, %c0_18], %12 {strides = array<i32>} : memref<1x16x128xf32, #tpu.memory_space<vmem>>, vector<1x16x128xf32>,
    return
  }
  func.func @transform_0(%arg0: i32) -> (i32, i32, i32) {
    %c0_i32 = arith.constant 0 : i32
    %c0_i32_0 = arith.constant 0 : i32
    %c0_i32_1 = arith.constant 0 : i32
    return %arg0, %c0_i32, %c0_i32_0 : i32, i32, i32
  }
  func.func @transform_1(%arg0: i32) -> (i32, i32, i32) {
    %c0_i32 = arith.constant 0 : i32
    %c0_i32_0 = arith.constant 0 : i32
    %c0_i32_1 = arith.constant 0 : i32
    return %arg0, %c0_i32, %c0_i32_0 : i32, i32, i32
  }
  func.func @transform_2(%arg0: i32) -> (i32, i32, i32) {
    %c0_i32 = arith.constant 0 : i32
    %c0_i32_0 = arith.constant 0 : i32
    %c0_i32_1 = arith.constant 0 : i32
    return %arg0, %c0_i32, %c0_i32_0 : i32, i32, i32
  }
  func.func @transform_3(%arg0: i32) -> (i32, i32, i32) {
    %c0_i32 = arith.constant 0 : i32
    %c0_i32_0 = arith.constant 0 : i32
    %c0_i32_1 = arith.constant 0 : i32
    return %arg0, %c0_i32, %c0_i32_0 : i32, i32, i32
  }
  func.func @transform_4(%arg0: i32) -> (i32, i32, i32) {
    %c0_i32 = arith.constant 0 : i32
    %c0_i32_0 = arith.constant 0 : i32
    %c0_i32_1 = arith.constant 0 : i32
    return %arg0, %c0_i32, %c0_i32_0 : i32, i32, i32
  }
}

</mosaic_0001>

<bundles_post_ra>
// kernel: tpu_custom_call.1
= control target key start
LH: loop header
LB: loop body
LE: loop exit
PB: predicated region body
PF: predicated region fallthrough
CT: control target
= control target key end

     0   :  { %s1629_s0 = inlined_call_operand.hbm [shape: f32[2,16,128], index: 0, kind: input, shape index: {}]   ;;  %s1630_s1 = inlined_call_operand.hbm [shape: f32[2,16,16], index: 1, kind: input, shape index: {}]   ;;  %s1631_s2 = inlined_call_operand.hbm [shape: f32[2,128,128], index: 2, kind: input, shape index: {}]   ;;  %s1632_s3 = inlined_call_operand.hbm [shape: f32[2,128,128], index: 3, kind: input, shape index: {}]   ;;  %s1633_s4 = inlined_call_operand.hbm [shape: f32[2,16,128], index: 4, kind: output, shape index: {}]  }
   0x1   :  { %1642 = sst [smem:[#allocation16_spill]] %s1629_s0 }
   0x2   :  { %1643 = sst [smem:[#allocation17_spill]] %s1630_s1 }
   0x3   :  { %9 = vsyncpa [#allocation3], 0 }
   0x4   :  { %11 = vsyncpa [#allocation3 + $0x1], 0 }
   0x5   :  { %12 = vsyncpa [#allocation6], 0 }
   0x6   :  { %14 = vsyncpa [#allocation6 + $0x1], 0 }
   0x7   :  { %15 = vsyncpa [#allocation9], 0 }
   0x8   :  { %17 = vsyncpa [#allocation9 + $0x1], 0 }
   0x9   :  { %18 = vsyncpa [#allocation4], 0 }
   0xa   :  { %20 = vsyncpa [#allocation4 + $0x1], 0  ;;  %s1285_s15 = smov 0   ;;  %s1287_s16 = smov 0  }
   0xb   :  { %s1289_s17 = smov 0   ;;  %s1291_s18 = smov 0  }
   0xc LB: > { %s1306_s19 = sadd.s32 4294967295, %s1249_s18   ;;  %s837_s20 = sadd.s32 4294967294, %s1249_s18   ;;  %s1249_s18 = sphi %s1291_s18, %s1667_s18   ;;  %s1245_s17 = sphi %s1289_s17, %s1666_s17   ;;  %s1241_s16 = sphi %s1287_s16, %s1665_s16   ;;  %s1237_s15 = sphi %s1285_s15, %s1664_s15  }
   0xd   : > { %s1310_s21 = sadd.s32 1, %s1249_s18   ;;  %s33_s22 = sadd.s32 1, %s1245_s17 }
   0xe   : > { %s30_s23 = ssub.s32 %s1249_s18, %s1310_s21  ;;  %p40_p0 = scmp.ne.s32.totalorder %s1245_s17, %s1241_s16 }
   0xf   : > { %p31_p1 = scmp.eq.s32.totalorder %s30_s23, 0  ;;  %p41_p2 = scmp.eq.s32.totalorder %s1249_s18, 0 }
  0x10   : > { %p46_p3 = scmp.ne.s32.totalorder %s1241_s16, %s1237_s15  ;;  %p47_p4 = scmp.eq.s32.totalorder %s1306_s19, 0 }
  0x11   : > { %s1322_s24 = scalar_select %p31_p1, %s1245_s17, %s33_s22  }
  0x12   : > { %p42_p5 = por %p41_p2, %p40_p0  ;;  %p1324_p6 = por %p47_p4, %p46_p3 }
  0x13   : > { %1644 = sst [smem:[#allocation15_spill]] %s1322_s24  ;;  %p148_p7 = scmp.eq.s32.totalorder %s1306_s19, 1 }
  0x14   : > { %s1645_s25 = scalar_select %p1324_p6, 1, 0 }
  0x15   : > { %p154_p8 = scmp.eq.s32.totalorder %s837_s20, 1  ;;  %p1027_p10 = scmp.lt.s32.totalorder %s1249_s18, 2 }
  0x16   : > { %p1331_p11 = por %p148_p7, %p40_p0  ;;  %s1340_s28 = sand.u32 1, %s1245_s17  }
  0x17   : > { %p1335_p12 = por %p154_p8, %p46_p3  ;;  %s867_s29 = sshll.u32 %s1249_s18, 8 }
  0x18   : > { %s1646_s26 = scalar_select %p1331_p11, 1, 0 }
  0x19   : > { %s1647_s27 = scalar_select %p1335_p12, 1, 0 }
  0x1a   : > { %s840_s30 = sshll.u32 %s1340_s28, 4  ;;  %p1344_p13 = pnand %p1027_p10, %p42_p5 }
  0x1b   : > { %s195_s6 = sand.u32 1, %s1249_s18   ;;  %s1649_s1 = sld [smem:[#allocation17_spill]] }
  0x1c   : > { %s199_s10 = scalar_lea.vmem [#allocation5], %s840_s30  ;;  %s1361_s12 = scalar_lea.sflag [#allocation6], %s195_s6 }
  0x1d   : > { %s206_s11 = sshll.u32 %s199_s10, 4  ;;  %p1367_p2 = pneg %p1344_p13  ;;  %s1358_s11 = int_to_ptr.vmem [resolvable:$true] %s206_s11 }
  0x21   : > { %s1354_s9 = scalar_lea.hbm %s1649_s1, %s867_s29  ;;  %s1070_s23 = scalar_lea.hbm %s1649_s1, 512 }
  0x22   : > { %s1065_s13 = scalar_lea.hbm %s1354_s9, 256  ;;  %p1071_p5 = scmp.lt.s32.totalorder %s1354_s9, %s1649_s1 }
  0x23   : > { %p1066_p1 = scmp.ne.s32.totalorder %s1354_s9, %s1065_s13  ;;  %p1072_p7 = scmp.lt.s32.totalorder %s1070_s23, %s1065_s13 }
  0x25   : > { %p1068_p3 = pnand %p1367_p2, %p1066_p1  ;;  %p1073_p8 = por %p1072_p7, %p1071_p5 }
  0x27   : > { %p1069_p4 = pneg %p1068_p3 }
  0x29   : > { %p1074_p10 = pnand %p1073_p8, %p1069_p4 }
  0x2b   : > { %1077 = shalt.err (!%p1074_p10)
}
  0x2c   : > { %s1078_s6 = scalar_lea.vmem %s1358_s11, 256  ;;  %s1251_s10 = smov [#allocation5]  }
  0x2d   : > { %p1079_p9 = scmp.ne.s32.totalorder %s1358_s11, %s1078_s6  ;;  %s1083_s20 = sshll.u32 %s1251_s10, 4  ;;  %s1084_s20 = int_to_ptr.vmem [resolvable:$false] %s1083_s20 }
  0x2e   : > { %s1085_s22 = scalar_lea.vmem %s1084_s20, 512  ;;  %p1086_p0 = scmp.lt.s32.totalorder %s1358_s11, %s1084_s20 }
  0x2f   : > { %p1081_p1 = pnand %p1079_p9, %p1367_p2  ;;  %p1087_p12 = scmp.lt.s32.totalorder %s1085_s22, %s1078_s6 }
  0x31   : > { %p1082_p3 = pneg %p1081_p1  ;;  %p1088_p11 = por %p1087_p12, %p1086_p0 }
  0x33   : > { %p1089_p6 = pnand %p1088_p11, %p1082_p3 }
  0x35   : > { %1092 = shalt.err (!%p1089_p6)
}
  0x36   : > { %s1636_s13 = smov 128   ;;  %s1638_s23 = smov 8  }
  0x37   : > { %1016 = dma.hbm_to_vmem [thread:$0]  (!%p1344_p13), %s1354_s9, 256, %s1358_s11, %s1361_s12, %s1636_s13, %s1636_s13, %s1638_s23  }
  0x38   : > { %p256_p9 = scmp.lt.s32.totalorder %s1249_s18, 3  ;;  %s1651_s0 = sld [smem:[#allocation16_spill]] }
  0x39   : > { %p1652_p6 = scmp.ge.s32.totalorder %s1249_s18, 1  ;;  %s178_s20 = scalar_lea.vmem [#allocation2], %s840_s30 }
  0x3a   : > { %s185_s22 = sshll.u32 %s178_s20, 4  ;;  %s1640_s9 = sshll.u32 %s1340_s28, 7  ;;  %s1409_s22 = int_to_ptr.vmem [resolvable:$true] %s185_s22 }
  0x3b   : > { %p1403_p11 = pnand %p1652_p6, %p256_p9  ;;  %s175_s11 = scalar_lea.sflag [#allocation3], %s1340_s28 }
  0x3d   : > { %s1653_s10 = scalar_select %p1403_p11, 1, 0 }
  0x3e   : > { %s1399_s6 = scalar_lea.hbm %s1651_s0, %s867_s29  ;;  %s1098_s8 = scalar_lea.hbm %s1651_s0, 512 }
  0x3f   : > { %s1093_s13 = scalar_lea.hbm %s1399_s6, 256  ;;  %p1099_p5 = scmp.lt.s32.totalorder %s1399_s6, %s1651_s0 }
  0x40   : > { %p1094_p12 = scmp.ne.s32.totalorder %s1399_s6, %s1093_s13  ;;  %p1100_p7 = scmp.lt.s32.totalorder %s1098_s8, %s1093_s13 }
  0x42   : > { %p1096_p0 = pnand %p1094_p12, %p1367_p2  ;;  %p1101_p8 = por %p1100_p7, %p1099_p5 }
  0x44   : > { %p1097_p4 = pneg %p1096_p0 }
  0x46   : > { %p1102_p10 = pnand %p1101_p8, %p1097_p4 }
  0x48   : > { %1105 = shalt.err (!%p1102_p10)
}
  0x49   : > { %s1106_s30 = scalar_lea.vmem %s1409_s22, 256  ;;  %s1254_s20 = smov [#allocation2]  }
  0x4a   : > { %p1107_p1 = scmp.ne.s32.totalorder %s1409_s22, %s1106_s30  ;;  %s1111_s29 = sshll.u32 %s1254_s20, 4  ;;  %s1112_s29 = int_to_ptr.vmem [resolvable:$false] %s1111_s29 }
  0x4b   : > { %s1113_s7 = scalar_lea.vmem %s1112_s29, 512  ;;  %p1114_p6 = scmp.lt.s32.totalorder %s1409_s22, %s1112_s29 }
  0x4c   : > { %p1109_p3 = pnand %p1107_p1, %p1367_p2  ;;  %p1115_p12 = scmp.lt.s32.totalorder %s1113_s7, %s1106_s30 }
  0x4e   : > { %p1110_p9 = pneg %p1109_p3  ;;  %p1116_p0 = por %p1115_p12, %p1114_p6 }
  0x50   : > { %p1117_p11 = pnand %p1116_p0, %p1110_p9 }
  0x52   : > { %1120 = shalt.err (!%p1117_p11)
}
  0x53   : > { %s1654_s1 = smov 8   ;;  %s1655_s13 = smov 128  }
  0x54   : > { %1013 = dma.hbm_to_vmem [thread:$0]  (!%p1344_p13), %s1399_s6, 256, %s1409_s22, %s175_s11, %s1655_s13, %s1655_s13, %s1654_s1  }
  0x55   : > { %s1641_s23 = sshll.u32 %s1249_s18, 11  ;;  %s220_s29 = scalar_lea.vmem [#allocation7], %s1640_s9 }
  0x56   : > { %s1442_s30 = scalar_lea.hbm %s1631_s2, %s1641_s23  ;;  %s227_s7 = sshll.u32 %s220_s29, 4  ;;  %s228_s7 = int_to_ptr.vmem [resolvable:$true] %s227_s7 }
  0x57   : > { %s1121_s0 = scalar_lea.hbm %s1442_s30, 2048  ;;  %s1126_s11 = scalar_lea.hbm %s1631_s2, 4096 }
  0x58   : > { %p1122_p11 = scmp.ne.s32.totalorder %s1442_s30, %s1121_s0  ;;  %p1127_p7 = scmp.lt.s32.totalorder %s1442_s30, %s1631_s2 }
  0x59   : > { %p1128_p8 = scmp.lt.s32.totalorder %s1126_s11, %s1121_s0 }
  0x5a   : > { %p1124_p4 = pnand %p1122_p11, %p1367_p2 }
  0x5b   : > { %p1129_p10 = por %p1128_p8, %p1127_p7 }
  0x5c   : > { %p1125_p5 = pneg %p1124_p4 }
  0x5e   : > { %p1130_p1 = pnand %p1129_p10, %p1125_p5 }
  0x60   : > { %1133 = shalt.err (!%p1130_p1)
}
  0x61   : > { %s1134_s20 = scalar_lea.vmem %s228_s7, 2048  ;;  %s1255_s29 = smov [#allocation7]  }
  0x62   : > { %p1135_p3 = scmp.ne.s32.totalorder %s228_s7, %s1134_s20  ;;  %s1139_s9 = sshll.u32 %s1255_s29, 4  ;;  %s1140_s9 = int_to_ptr.vmem [resolvable:$false] %s1139_s9 }
  0x63   : > { %s1141_s23 = scalar_lea.vmem %s1140_s9, 4096  ;;  %p1142_p12 = scmp.lt.s32.totalorder %s228_s7, %s1140_s9 }
  0x64   : > { %p1137_p9 = pnand %p1135_p3, %p1367_p2  ;;  %p1143_p0 = scmp.lt.s32.totalorder %s1141_s23, %s1134_s20 }
  0x66   : > { %p1138_p6 = pneg %p1137_p9  ;;  %p1144_p11 = por %p1143_p0, %p1142_p12 }
  0x68   : > { %p1145_p4 = pnand %p1144_p11, %p1138_p6 }
  0x6a   : > { %1148 = shalt.err (!%p1145_p4)
}
  0x6b   : > { %1019 = dma.hbm_to_vmem [thread:$0]  (!%p1344_p13), %s1442_s30, 2048, %s228_s7, %s1361_s12, %s1655_s13, %s1655_s13, %s1654_s1  }
  0x6c   : > { %s1656_s0 = sshll.u32 %s1249_s18, 11  ;;  %s1657_s23 = sshll.u32 %s1340_s28, 7 }
  0x6d   : > { %s1471_s9 = scalar_lea.hbm %s1632_s3, %s1656_s0  ;;  %s241_s22 = scalar_lea.vmem [#allocation8], %s1657_s23 }
  0x6e   : > { %s248_s11 = sshll.u32 %s241_s22, 4  ;;  %s238_s8 = scalar_lea.sflag [#allocation9], %s1340_s28  ;;  %s1475_s11 = int_to_ptr.vmem [resolvable:$true] %s248_s11 }
  0x6f   : > { %s1149_s20 = scalar_lea.hbm %s1471_s9, 2048  ;;  %s1154_s7 = scalar_lea.hbm %s1632_s3, 4096 }
  0x70   : > { %p1150_p5 = scmp.ne.s32.totalorder %s1471_s9, %s1149_s20  ;;  %p1155_p10 = scmp.lt.s32.totalorder %s1471_s9, %s1632_s3 }
  0x71   : > { %p1156_p1 = scmp.lt.s32.totalorder %s1154_s7, %s1149_s20 }
  0x72   : > { %p1152_p7 = pnand %p1150_p5, %p1367_p2 }
  0x73   : > { %p1157_p3 = por %p1156_p1, %p1155_p10 }
  0x74   : > { %p1153_p8 = pneg %p1152_p7 }
  0x76   : > { %p1158_p9 = pnand %p1157_p3, %p1153_p8 }
  0x78   : > { %1161 = shalt.err (!%p1158_p9)
}
  0x79   : > { %s1162_s28 = scalar_lea.vmem %s1475_s11, 2048  ;;  %s1256_s24 = smov [#allocation8]  }
  0x7a   : > { %p1163_p6 = scmp.ne.s32.totalorder %s1475_s11, %s1162_s28  ;;  %s1167_s6 = sshll.u32 %s1256_s24, 4  ;;  %s1168_s6 = int_to_ptr.vmem [resolvable:$false] %s1167_s6 }
  0x7b   : > { %s1169_s23 = scalar_lea.vmem %s1168_s6, 4096  ;;  %p1170_p11 = scmp.lt.s32.totalorder %s1475_s11, %s1168_s6 }
  0x7c   : > { %p1165_p12 = pnand %p1163_p6, %p1367_p2  ;;  %p1171_p4 = scmp.lt.s32.totalorder %s1169_s23, %s1162_s28 }
  0x7e   : > { %p1166_p0 = pneg %p1165_p12  ;;  %p1172_p5 = por %p1171_p4, %p1170_p11 }
  0x80   : > { %p1173_p7 = pnand %p1172_p5, %p1166_p0 }
  0x82   : > { %1176 = shalt.err (!%p1173_p7)
}
  0x83   : > { %1022 = dma.hbm_to_vmem [thread:$0]  (!%p1344_p13), %s1471_s9, 2048, %s1475_s11, %s238_s8, %s1655_s13, %s1655_s13, %s1654_s1  }
  0x84   : > { %p1658_p2 = scmp.ne.s32.totalorder %s1653_s10, 0 }
  0x85   : > { %s1504_s14 = sand.u32 (!%p1658_p2), 1, %s1241_s16   ;;  %p1659_p8 = scmp.ne.s32.totalorder (!%p1658_p2), %s1645_s25, 0 }
  0x86   : > { %260 = sbr.rel (%p1658_p2) target bundleno = 984 (0x3d8), region = 36  ;;  %s1507_s22 = sshll.u32 (!%p1658_p2), %s1504_s14, 4 }
  0x87   : > { %s263_s20 = scalar_lea.sflag (!%p1658_p2), [#allocation3], %s1504_s14  ;;  %s266_s5 = scalar_lea.vmem (!%p1658_p2), [#allocation2], %s1507_s22 }
  0x8b   : > { %1220 = dma.done.wait (%p1659_p8), %s263_s20, 256  }
  0x8c   : > { %1222 = vsyncadd (%p1659_p8), %s263_s20, 4294967040  ;;  %s271_s10 = sand.u32 1, %s1306_s19   ;;  %s275_s13 = scalar_lea.vmem [#allocation5], %s1507_s22 }
  0x8d   : > { %s272_s1 = scalar_lea.sflag [#allocation6], %s271_s10 }
  0x8e   : > { %1224 = dma.done.wait (%p1659_p8), %s272_s1, 2304  }
  0x8f   : > { %1226 = vsyncadd (%p1659_p8), %s272_s1, 4294964992  ;;  %s855_s9 = sshll.u32 %s1504_s14, 7  ;;  %s290_s8 = scalar_lea.sflag [#allocation9], %s1504_s14 }
  0x90   : > { %s1522_s11 = scalar_lea.vmem [#allocation7], %s855_s9  ;;  %s1525_s12 = scalar_lea.vmem [#allocation8], %s855_s9 }
  0x91   : > { %1228 = dma.done.wait (%p1659_p8), %s290_s8, 2048  }
  0x92   : > { %1230 = vsyncadd (%p1659_p8), %s290_s8, 4294965248  ;;  %v352_v0 = vld [vmem:[%s1522_s11 + $0x78] sm:$0xff]  ;;  %v351_v1 = vld [vmem:[%s1522_s11 + $0x70] sm:$0xff]  ;;  %vm444_vm0 = vcmask 130048   ;;  %s332_s25 = scalar_lea.vmem [#allocation10], %s1507_s22  ;;  %s871_s7 = sshll.u32 %s1306_s19, 8 }
  0x93   : > { %916 = vmatprep.subr.mxu0 %v352_v0  ;;  %v350_v2 = vld [vmem:[%s1522_s11 + $0x68] sm:$0xff]  ;;  %v349_v3 = vld [vmem:[%s1522_s11 + $0x60] sm:$0xff]  ;;  %v348_v5 = vld [vmem:[%s1522_s11 + $0x58] sm:$0xff]  ;;  %s698_s30 = sshll.u32 %s332_s25, 4  ;;  %s1586_s28 = scalar_lea.hbm %s1633_s4, %s871_s7  ;;  %s1581_s30 = int_to_ptr.vmem [resolvable:$true] %s698_s30 }
  0x94   : > { %917 = vmatpush3.msra.mxu0 %v352_v0  ;;  %v333_v4 = vld [vmem:[%s266_s5] sm:$0xff]  ;;  %v346_v7 = vld [vmem:[%s1522_s11 + $0x48] sm:$0xff]  ;;  %v344_v9 = vld [vmem:[%s1522_s11 + $0x38] sm:$0xff]  ;;  %s685_s24 = scalar_lea.sflag [#allocation4], %s1504_s14  ;;  %s1177_s6 = scalar_lea.vmem %s1581_s30, 256 }
  0x95   : > { %918 = vmatprep.subr.mxu0 %v351_v1  ;;  %948 = vmatprep.mubr.f32.mxu0 %v333_v4  ;;  %v347_v6 = vld [vmem:[%s1522_s11 + $0x50] sm:$0xff]  ;;  %v345_v8 = vld [vmem:[%s1522_s11 + $0x40] sm:$0xff]  ;;  %v342_v11 = vld [vmem:[%s1522_s11 + $0x28] sm:$0xff]  ;;  %p1178_p13 = scmp.ne.s32.totalorder %s1581_s30, %s1177_s6  ;;  %p1660_p10 = scmp.ne.s32.totalorder %s1646_s26, 0 }
  0x96   : > { %919 = vmatpush3.msra.mxu0 %v351_v1  ;;  %v343_v10 = vld [vmem:[%s1522_s11 + $0x30] sm:$0xff]  ;;  %v341_v12 = vld [vmem:[%s1522_s11 + $0x20] sm:$0xff]  ;;  %v340_v13 = vld [vmem:[%s1522_s11 + $0x18] sm:$0xff]  ;;  %s1257_s19 = smov [#allocation10]  }
  0x97   : > { %920 = vmatprep.subr.mxu0 %v350_v2  ;;  %v339_v14 = vld [vmem:[%s1522_s11 + $0x10] sm:$0xff]  ;;  %v338_v15 = vld [vmem:[%s1522_s11 + $0x8] sm:$0xff]  ;;  %v337_v16 = vld [vmem:[%s1522_s11] sm:$0xff]  ;;  %p1179_p1 = pnand %p1178_p13, %p1660_p10  ;;  %s1181_s23 = sshll.u32 %s1257_s19, 4  ;;  %s1182_s23 = int_to_ptr.vmem [resolvable:$false] %s1181_s23 }
  0x98   : > { %921 = vmatpush3.msra.mxu0 %v350_v2  ;;  %v334_v17 = vld [vmem:[%s266_s5 + $0x8] sm:$0xff]  ;;  %v335_v18 = vld [vmem:[%s275_s13] sm:$0xff]  ;;  %s1183_s22 = scalar_lea.vmem %s1182_s23, 512  ;;  %p1184_p9 = scmp.lt.s32.totalorder %s1581_s30, %s1182_s23 }
  0x99   : > { %922 = vmatprep.subr.mxu0 %v349_v3  ;;  %955 = vmatprep.mubr.msk.f32.mxu1 %vm444_vm0, %v335_v18  ;;  %v1557_v21 = vld [vmem:[%s275_s13 + $0x8] sm:$0xff]  ;;  %v367_v23 = vld [vmem:[%s1525_s12 + $0x70] sm:$0xff]  ;;  %v365_v25 = vld [vmem:[%s1525_s12 + $0x60] sm:$0xff]  ;;  %p1180_p3 = pneg %p1179_p1  ;;  %p1185_p6 = scmp.lt.s32.totalorder %s1183_s22, %s1177_s6 }
  0x9a   : > { %923 = vmatpush3.msra.mxu0 %v349_v3  ;;  %v368_v22 = vld [vmem:[%s1525_s12 + $0x78] sm:$0xff]  ;;  %v366_v24 = vld [vmem:[%s1525_s12 + $0x68] sm:$0xff]  ;;  %v363_v27 = vld [vmem:[%s1525_s12 + $0x50] sm:$0xff] }
  0x9b   : > { %924 = vmatprep.subr.mxu0 %v348_v5  ;;  %v364_v26 = vld [vmem:[%s1525_s12 + $0x58] sm:$0xff]  ;;  %v362_v28 = vld [vmem:[%s1525_s12 + $0x48] sm:$0xff]  ;;  %v361_v29 = vld [vmem:[%s1525_s12 + $0x40] sm:$0xff]  ;;  %p1186_p12 = por %p1185_p6, %p1184_p9 }
  0x9c   : > { %925 = vmatpush3.msra.mxu0 %v348_v5  ;;  %v360_v30 = vld [vmem:[%s1525_s12 + $0x38] sm:$0xff]  ;;  %v359_v31 = vld [vmem:[%s1525_s12 + $0x30] sm:$0xff]  ;;  %v358_v32 = vld [vmem:[%s1525_s12 + $0x28] sm:$0xff] }
  0x9d   : > { %926 = vmatprep.subr.mxu0 %v347_v6  ;;  %v357_v33 = vld [vmem:[%s1525_s12 + $0x20] sm:$0xff]  ;;  %v356_v34 = vld [vmem:[%s1525_s12 + $0x18] sm:$0xff]  ;;  %v355_v35 = vld [vmem:[%s1525_s12 + $0x10] sm:$0xff]  ;;  %p1187_p0 = pnand %p1186_p12, %p1180_p3 }
  0x9e   : > { %927 = vmatpush3.msra.mxu0 %v347_v6  ;;  %v354_v36 = vld [vmem:[%s1525_s12 + $0x8] sm:$0xff]  ;;  %v353_v37 = vld [vmem:[%s1525_s12] sm:$0xff] }
  0x9f   : > { %928 = vmatprep.subr.mxu0 %v346_v7 }
  0xa0   : > { %929 = vmatpush3.msra.mxu0 %v346_v7 }
  0xa1   : > { %930 = vmatprep.subr.mxu0 %v345_v8 }
  0xa2   : > { %931 = vmatpush3.msra.mxu0 %v345_v8 }
  0xa3   : > { %932 = vmatprep.subr.mxu0 %v344_v9 }
  0xa4   : > { %933 = vmatpush3.msra.mxu0 %v344_v9 }
  0xa5   : > { %934 = vmatprep.subr.mxu0 %v343_v10 }
  0xa6   : > { %935 = vmatpush3.msra.mxu0 %v343_v10 }
  0xa7   : > { %936 = vmatprep.subr.mxu0 %v342_v11 }
  0xa8   : > { %937 = vmatpush3.msra.mxu0 %v342_v11 }
  0xa9   : > { %938 = vmatprep.subr.mxu0 %v341_v12 }
  0xaa   : > { %939 = vmatpush3.msra.mxu0 %v341_v12 }
  0xab   : > { %940 = vmatprep.subr.mxu0 %v340_v13 }
  0xac   : > { %941 = vmatpush3.msra.mxu0 %v340_v13 }
  0xad   : > { %942 = vmatprep.subr.mxu0 %v339_v14 }
  0xae   : > { %943 = vmatpush3.msra.mxu0 %v339_v14 }
  0xaf   : > { %944 = vmatprep.subr.mxu0 %v338_v15 }
  0xb0   : > { %945 = vmatpush3.msra.mxu0 %v338_v15 }
  0xb1   : > { %946 = vmatprep.subr.mxu0 %v337_v16 }
  0xb2   : > { %947 = vmatpush3.msra.mxu0 %v337_v16 }
  0xb3   : > { %949 = vmatmul.mubr.f32.vlgmr.msra.gmra.mxu0 %v334_v17 }
  0xb4   : > { %997 = vmatprep.mubr.msk.f32.mxu0 %vm444_vm0, %v335_v18 }
 0x173   : > { %v950_v19 = vpop.f32.mrf.mxu0 }
 0x174   : > { %951 = vmatprep.subr.mxu1 %v950_v19 }
 0x175   : > { %v435_v20 = vpop.f32.mrf.mxu0  ;;  %952 = vmatpush3.msra.mxu1 %v950_v19 }
 0x176   : > { %953 = vmatprep.subr.mxu1 %v435_v20 }
 0x177   : > { %954 = vmatpush3.msra.mxu1 %v435_v20 }
 0x178   : > { %956 = vmatmul.mubr.msk.f32.vlgmr.msra.gmra.mxu1 %vm444_vm0, %v1557_v21  ;;  %958 = vmatprep.subr.mxu1 %v368_v22 }
 0x179   : > { %959 = vmatpush3.msra.mxu1 %v368_v22 }
 0x17a   : > { %960 = vmatprep.subr.mxu1 %v367_v23 }
 0x17b   : > { %961 = vmatpush3.msra.mxu1 %v367_v23 }
 0x17c   : > { %962 = vmatprep.subr.mxu1 %v366_v24 }
 0x17d   : > { %963 = vmatpush3.msra.mxu1 %v366_v24 }
 0x17e   : > { %964 = vmatprep.subr.mxu1 %v365_v25 }
 0x17f   : > { %965 = vmatpush3.msra.mxu1 %v365_v25 }
 0x180   : > { %966 = vmatprep.subr.mxu1 %v364_v26 }
 0x181   : > { %967 = vmatpush3.msra.mxu1 %v364_v26 }
 0x182   : > { %968 = vmatprep.subr.mxu1 %v363_v27 }
 0x183   : > { %969 = vmatpush3.msra.mxu1 %v363_v27 }
 0x184   : > { %970 = vmatprep.subr.mxu1 %v362_v28 }
 0x185   : > { %971 = vmatpush3.msra.mxu1 %v362_v28 }
 0x186   : > { %972 = vmatprep.subr.mxu1 %v361_v29 }
 0x187   : > { %973 = vmatpush3.msra.mxu1 %v361_v29 }
 0x188   : > { %974 = vmatprep.subr.mxu1 %v360_v30 }
 0x189   : > { %975 = vmatpush3.msra.mxu1 %v360_v30 }
 0x18a   : > { %976 = vmatprep.subr.mxu1 %v359_v31 }
 0x18b   : > { %977 = vmatpush3.msra.mxu1 %v359_v31 }
 0x18c   : > { %978 = vmatprep.subr.mxu1 %v358_v32 }
 0x18d   : > { %979 = vmatpush3.msra.mxu1 %v358_v32 }
 0x18e   : > { %980 = vmatprep.subr.mxu1 %v357_v33 }
 0x18f   : > { %981 = vmatpush3.msra.mxu1 %v357_v33 }
 0x190   : > { %982 = vmatprep.subr.mxu1 %v356_v34 }
 0x191   : > { %983 = vmatpush3.msra.mxu1 %v356_v34 }
 0x192   : > { %984 = vmatprep.subr.mxu1 %v355_v35 }
 0x193   : > { %985 = vmatpush3.msra.mxu1 %v355_v35 }
 0x194   : > { %986 = vmatprep.subr.mxu1 %v354_v36 }
 0x195   : > { %987 = vmatpush3.msra.mxu1 %v354_v36 }
 0x196   : > { %988 = vmatprep.subr.mxu1 %v353_v37 }
 0x197   : > { %989 = vmatpush3.msra.mxu1 %v353_v37 }
 0x238   : > { %v957_v38 = vpop.f32.mrf.mxu1 }
 0x239   : > { %v527_v41 = vmax.f32 %v957_v38, 0.0 }
 0x23a   : > { %v517_v39 = vpop.f32.mrf.mxu1 }
 0x23b   : > { %v526_v40 = vmax.f32 %v517_v39, 0.0 }
 0x23d   : > { %990 = vmatprep.mubr.f32.mxu1 %v526_v40 }
 0x23e   : > { %991 = vmatmul.mubr.f32.vlgmr.msra.gmra.mxu1 %v527_v41 }
 0x2fe   : > { %v992_v42 = vpop.f32.mrf.mxu1 }
 0x2ff   : > { %993 = vmatprep.subr.mxu0 %v992_v42 }
 0x300   : > { %v594_v43 = vpop.f32.mrf.mxu1  ;;  %994 = vmatpush3.msra.mxu0 %v992_v42 }
 0x301   : > { %995 = vmatprep.subr.mxu0 %v594_v43 }
 0x302   : > { %996 = vmatpush3.msra.mxu0 %v594_v43 }
 0x303   : > { %998 = vmatmul.mubr.msk.f32.vlgmr.msra.gmra.mxu0 %vm444_vm0, %v1557_v21 }
 0x3c3   : > { %v999_v44 = vpop.f32.mrf.mxu0 }
 0x3c4   : > { %v679_v45 = vmax.f32 %v999_v44, 0.0 }
 0x3c5   : > { %v669_v46 = vpop.f32.mrf.mxu0 }
 0x3c6   : > { %v681_v47 = vadd.f32 %v679_v45, %v527_v41  ;;  %v678_v48 = vmax.f32 %v669_v46, 0.0 }
 0x3c8   : > { %683 = vst [vmem:[%s332_s25 + $0x8] sm:$0xff] %v681_v47  ;;  %v680_v49 = vadd.f32 %v678_v48, %v526_v40 }
 0x3ca   : > { %682 = vst [vmem:[%s332_s25] sm:$0xff] %v680_v49 }
 0x3cb   : > { %1190 = shalt.err (!%p1187_p0)
}
 0x3cc   : > { %s1191_s20 = scalar_lea.hbm %s1586_s28, 256  ;;  %s1195_s1 = scalar_lea.hbm %s1633_s4, 512 }
 0x3cd   : > { %p1192_p11 = scmp.ne.s32.totalorder %s1586_s28, %s1191_s20  ;;  %p1196_p7 = scmp.lt.s32.totalorder %s1586_s28, %s1633_s4 }
 0x3ce   : > { %p1197_p2 = scmp.lt.s32.totalorder %s1195_s1, %s1191_s20 }
 0x3cf   : > { %p1193_p4 = pnand %p1192_p11, %p1660_p10 }
 0x3d0   : > { %p1198_p8 = por %p1197_p2, %p1196_p7 }
 0x3d1   : > { %p1194_p5 = pneg %p1193_p4 }
 0x3d3   : > { %p1199_p13 = pnand %p1198_p8, %p1194_p5 }
 0x3d5   : > { %1202 = shalt.err (!%p1199_p13)
}
 0x3d6   : > { %s1258_s11 = smov 128   ;;  %s1259_s8 = smov 8  }
 0x3d7   : > { %1008 = dma.vmem_to_hbm [thread:$0]  (%p1660_p10), %s1581_s30, 256, %s1586_s28, %s685_s24, %s1258_s11, %s1258_s11, %s1259_s8  }
 0x3d8 PF: > { %s713_s12 = sand.u32 1, %s1237_s15   ;;  %p1661_p1 = scmp.ne.s32.totalorder %s1647_s27, 0 }
 0x3d9   : > { %p1662_p3 = scmp.ge.s32.totalorder %s1249_s18, 2  ;;  %s714_s25 = scalar_lea.sflag [#allocation4], %s713_s12 }
 0x3db   : > { %p1024_p9 = pnand %p1662_p3, %p1661_p1 }
 0x3dd   : > { %p1025_p6 = pneg %p1024_p9 }
 0x3df   : > { %1232 = dma.done.wait (%p1025_p6), %s714_s25, 256  }
 0x3e0   : > { %1234 = vsyncadd (%p1025_p6), %s714_s25, 4294967040  ;;  %s1663_s7 = sld [smem:[#allocation15_spill]]  ;;  %p23_p12 = scmp.ge.s32.totalorder %s1310_s21, 4  }
 0x3e1   : > { %s1664_s15 = smov %s1241_s16  ;;  %s1665_s16 = smov %s1245_s17 }
 0x3e2   : > { %s1667_s18 = smov %s1310_s21  ;;  %25 = sbr.rel (!%p23_p12) target bundleno = 12 (0xc), region = 118 }
 0x3e6   : > { %s1666_s17 = smov %s1663_s7 }
 0x3e7   :  { %719 = vsyncpa [#allocation3], 1 }
 0x3e8   :  { %721 = vsyncpa [#allocation3 + $0x1], 1 }
 0x3e9   :  { %722 = vsyncpa [#allocation6], 1 }
 0x3ea   :  { %724 = vsyncpa [#allocation6 + $0x1], 1 }
 0x3eb   :  { %725 = vsyncpa [#allocation9], 1 }
 0x3ec   :  { %727 = vsyncpa [#allocation9 + $0x1], 1 }
 0x3ed   :  { %728 = vsyncpa [#allocation4], 1 }
 0x3ee   :  { %730 = vsyncpa [#allocation4 + $0x1], 1 }

</bundles_post_ra>
